<compile_context>
chip_gen: v6e
topology: v6e:2x2x1
jax: 0.10.0
libtpu: 0.0.40
codegen_flags: <defaults>
</compile_context>

<pallas_src>
import jax
import jax.numpy as jnp
from jax.experimental import pallas as pl
from jax.experimental.pallas import tpu as pltpu


def mlp_kernel(x_ref, w1_ref, b1_ref, w2_ref, b2_ref, o_ref):
    # Load tile once; cast activations to bf16 for the MXU (no-op when x is bf16).
    x = x_ref[...].astype(jnp.bfloat16)
    # Hoisted bias loads (single read per grid step; no per-op re-broadcast).
    b1 = b1_ref[...]
    b2 = b2_ref[...]

    # Layer 1: bf16 MXU matmul, f32 accumulation; bias + ReLU in f32 on the VPU.
    h = jnp.dot(x, w1_ref[...], preferred_element_type=jnp.float32)
    h = jnp.maximum(h + b1, 0.0)

    # Layer 2: same pattern; f32 ReLU output recast to bf16 for the MXU.
    o = jnp.dot(h.astype(jnp.bfloat16), w2_ref[...], preferred_element_type=jnp.float32)
    o = jnp.maximum(o + b2, 0.0)

    o_ref[...] = o.astype(o_ref.dtype)


def _round_up(n, m):
    return ((n + m - 1) // m) * m


def _choose_tm(batch, max_tm):
    """Adaptive batch tile: as large as max_tm, sublane-aligned (multiple of 8),
    but always >= 2 grid steps when the batch allows it (v7x megacore + overlap)."""
    if batch <= 16:
        return _round_up(max(batch, 1), 8)
    tm = min(max_tm, _round_up(batch, 8))
    if pl.cdiv(batch, tm) < 2:          # don't collapse to a 1-step grid
        tm = _round_up(pl.cdiv(batch, 2), 8)
    return tm


def mlp_forward(x, w1_t, b1_2d, w2_t, b2_2d, *, max_tm=512, out_dtype=jnp.bfloat16):
    """Fused MLP forward.

    x     : [B, d0]  activations (ideally bf16; any float dtype works)
    w1_t  : [d0, d1] bf16, already transposed to [in, out]
    b1_2d : [1, d1]  f32
    w2_t  : [d1, d2] bf16
    b2_2d : [1, d2]  f32
    """
    B, d0 = x.shape
    d1 = w1_t.shape[1]
    d2 = w2_t.shape[1]

    tm = _choose_tm(B, max_tm)
    Bp = _round_up(B, tm)
    if Bp != B:
        # Pad the ragged tail once outside the kernel; padded rows are sliced off below.
        x = jnp.pad(x, ((0, Bp - B), (0, 0)))
    grid = (Bp // tm,)

    # VMEM budget: double-buffered x/out tiles + single-buffered bf16 weights
    # + f32 intermediate h (+ its bf16 recast) + tiny biases.
    x_b = jnp.dtype(x.dtype).itemsize
    o_b = jnp.dtype(out_dtype).itemsize
    est = (2 * tm * d0 * x_b
           + 2 * tm * d2 * o_b
           + (d0 * d1 + d1 * d2) * 2
           + 2 * 2 * (d1 + d2) * 4
           + tm * d1 * (4 + 2))
    vmem_limit = min(64 * 1024 * 1024, max(16 * 1024 * 1024, int(1.5 * est)))

    out = pl.pallas_call(
        mlp_kernel,
        out_shape=jax.ShapeDtypeStruct((Bp, d2), out_dtype),
        grid=grid,
        in_specs=[
            # x: batch-tiled, double-buffered by the pipeline.
            pl.BlockSpec((tm, d0), lambda i: (i, 0)),
            # Weights: resident across the grid, single-buffered (constant index_map).
            pl.BlockSpec((d0, d1), lambda i: (0, 0), pipeline_mode=pl.Buffered(1)),
            pl.BlockSpec((1, d1), lambda i: (0, 0)),     # b1 (tiny, default buffering)
            pl.BlockSpec((d1, d2), lambda i: (0, 0), pipeline_mode=pl.Buffered(1)),
            pl.BlockSpec((1, d2), lambda i: (0, 0)),     # b2
        ],
        out_specs=pl.BlockSpec((tm, d2), lambda i: (i, 0)),
        compiler_params=pltpu.CompilerParams(
            dimension_semantics=("parallel",),           # lets v7x shard across both TCs
            vmem_limit_bytes=vmem_limit,
        ),
    )(x, w1_t, b1_2d, w2_t, b2_2d)

    return out[:B] if Bp != B else out


if __name__ == "__main__":
    # MXU/lane-friendly dims (multiples of 128); batch deliberately NOT a multiple of
    # the tile to exercise the pad-and-slice path.
    mnist_dims = [256, 256, 128]   # d0, d1, d2
    batch = 300
    d0, d1, d2 = mnist_dims

    key = jax.random.PRNGKey(0)
    kx, kw1, kb1, kw2, kb2 = jax.random.split(key, 5)

    x_f32 = jax.random.normal(kx, (batch, d0), dtype=jnp.float32)

    # nn.Linear-style init: U(-1/sqrt(fan_in), +1/sqrt(fan_in)), PyTorch layout [out, in].
    lim1 = 1.0 / (d0 ** 0.5)
    lim2 = 1.0 / (d1 ** 0.5)
    w1 = jax.random.uniform(kw1, (d1, d0), jnp.float32, -lim1, lim1)
    b1 = jax.random.uniform(kb1, (d1,), jnp.float32, -lim1, lim1)
    w2 = jax.random.uniform(kw2, (d2, d1), jnp.float32, -lim2, lim2)
    b2 = jax.random.uniform(kb2, (d2,), jnp.float32, -lim2, lim2)

    # One-time parameter prep (static inference weights): transpose to [in, out],
    # cast matmul operands to bf16, lift biases to (1, out) f32.
    w1_t = w1.T.astype(jnp.bfloat16)   # [d0, d1]
    w2_t = w2.T.astype(jnp.bfloat16)   # [d1, d2]
    b1_2d = b1.reshape(1, d1).astype(jnp.float32)
    b2_2d = b2.reshape(1, d2).astype(jnp.float32)

    # Producer emits bf16 activations -> halves input/output HBM bytes for the
    # memory-bound kernel.
    x = x_f32.astype(jnp.bfloat16)

    out = mlp_forward(x, w1_t, b1_2d, w2_t, b2_2d, max_tm=512)
    out = jax.block_until_ready(out)
    assert out.shape == (batch, d2) and out.dtype == jnp.bfloat16
    out_f32 = out.astype(jnp.float32)

    # Reference 1: identical bf16-operand / f32-accumulate math (tight check, only the
    # final bf16 store quantization differs).
    h_ref = jnp.maximum(jnp.dot(x, w1_t, preferred_element_type=jnp.float32) + b1_2d, 0.0)
    ref_bf = jnp.maximum(
        jnp.dot(h_ref.astype(jnp.bfloat16), w2_t, preferred_element_type=jnp.float32) + b2_2d, 0.0
    )
    assert jnp.allclose(out_f32, ref_bf, atol=2e-2, rtol=2e-2)

    # Reference 2: pure-f32 PyTorch semantics (loose check, bf16 rounding allowed).
    ref_f32 = jnp.maximum(jnp.maximum(x_f32 @ w1.T + b1, 0.0) @ w2.T + b2, 0.0)
    assert jnp.allclose(out_f32, ref_f32, atol=8e-2, rtol=8e-2)

    print("KERNEL_OK")
</pallas_src>

<mosaic_0001>
module attributes {stable_mosaic.version = 11 : i64} {
  func.func @mlp_kernel(%arg0: i32, %arg1: memref<152x256xbf16, #tpu.memory_space<vmem>>, %arg2: memref<256x256xbf16, #tpu.memory_space<vmem>>, %arg3: memref<1x256xf32, #tpu.memory_space<vmem>>, %arg4: memref<256x128xbf16, #tpu.memory_space<vmem>>, %arg5: memref<1x128xf32, #tpu.memory_space<vmem>>, %arg6: memref<152x128xbf16, #tpu.memory_space<vmem>>) attributes {dimension_semantics = [#tpu.dimension_semantics<parallel>], iteration_bounds = array<i64: 2>, scalar_prefetch = 0 : i64, scratch_operands = 0 : i64, tpu.core_type = #tpu.core_type<tc>, window_params = [{transform_indices = @transform_0, window_bounds = array<i64: 152, 256>}, {pipeline_mode = #tpu.pipeline_mode<synchronous>, transform_indices = @transform_1, window_bounds = array<i64: 256, 256>}, {pipeline_mode = #tpu.pipeline_mode<synchronous>, transform_indices = @transform_2, window_bounds = array<i64: 1, 256>}, {pipeline_mode = #tpu.pipeline_mode<synchronous>, transform_indices = @transform_3, window_bounds = array<i64: 256, 128>}, {pipeline_mode = #tpu.pipeline_mode<synchronous>, transform_indices = @transform_4, window_bounds = array<i64: 1, 128>}, {transform_indices = @transform_5, window_bounds = array<i64: 152, 128>}]} {
    %c0 = arith.constant 0 : index
    %c0_0 = arith.constant 0 : index
    %0 = vector.load %arg1[%c0, %c0_0] : memref<152x256xbf16, #tpu.memory_space<vmem>>, vector<152x256xbf16>
    %c0_1 = arith.constant 0 : index
    %c0_2 = arith.constant 0 : index
    %1 = vector.load %arg3[%c0_1, %c0_2] : memref<1x256xf32, #tpu.memory_space<vmem>>, vector<1x256xf32>
    %c0_3 = arith.constant 0 : index
    %c0_4 = arith.constant 0 : index
    %2 = vector.load %arg5[%c0_3, %c0_4] : memref<1x128xf32, #tpu.memory_space<vmem>>, vector<1x128xf32>
    %c0_5 = arith.constant 0 : index
    %c0_6 = arith.constant 0 : index
    %3 = vector.load %arg2[%c0_5, %c0_6] : memref<256x256xbf16, #tpu.memory_space<vmem>>, vector<256x256xbf16>
    %cst = arith.constant dense<0.000000e+00> : vector<152x256xf32>
    %4 = tpu.matmul %0, %3, %cst {dimension_numbers = #tpu.dot_dimension_numbers<[1], [0], [0], [1], [0, 0, 1, 1], [], []>} : vector<152x256xbf16>, vector<256x256xbf16>, vector<152x256xf32> -> vector<152x256xf32>
    %5 = vector.broadcast %1 : vector<1x256xf32> to vector<152x256xf32>
    %6 = arith.addf %4, %5 : vector<152x256xf32>
    %cst_7 = arith.constant 0.000000e+00 : f32
    %7 = vector.broadcast %cst_7 : f32 to vector<152x256xf32>
    %8 = arith.maximumf %6, %7 : vector<152x256xf32>
    %9 = arith.truncf %8 : vector<152x256xf32> to vector<152x256xbf16>
    %c0_8 = arith.constant 0 : index
    %c0_9 = arith.constant 0 : index
    %10 = vector.load %arg4[%c0_8, %c0_9] : memref<256x128xbf16, #tpu.memory_space<vmem>>, vector<256x128xbf16>
    %cst_10 = arith.constant dense<0.000000e+00> : vector<152x128xf32>
    %11 = tpu.matmul %9, %10, %cst_10 {dimension_numbers = #tpu.dot_dimension_numbers<[1], [0], [0], [1], [0, 0, 1, 1], [], []>} : vector<152x256xbf16>, vector<256x128xbf16>, vector<152x128xf32> -> vector<152x128xf32>
    %12 = vector.broadcast %2 : vector<1x128xf32> to vector<152x128xf32>
    %13 = arith.addf %11, %12 : vector<152x128xf32>
    %cst_11 = arith.constant 0.000000e+00 : f32
    %14 = vector.broadcast %cst_11 : f32 to vector<152x128xf32>
    %15 = arith.maximumf %13, %14 : vector<152x128xf32>
    %16 = arith.truncf %15 : vector<152x128xf32> to vector<152x128xbf16>
    %c0_12 = arith.constant 0 : index
    %c0_13 = arith.constant 0 : index
    %17 = vector.load %arg6[%c0_12, %c0_13] : memref<152x128xbf16, #tpu.memory_space<vmem>>, vector<152x128xbf16>
    tpu.vector_store %arg6[%c0_12, %c0_13], %16 {strides = array<i32>} : memref<152x128xbf16, #tpu.memory_space<vmem>>, vector<152x128xbf16>,
    return
  }
  func.func @transform_0(%arg0: i32) -> (i32, i32) {
    %c0_i32 = arith.constant 0 : i32
    %c0_i32_0 = arith.constant 0 : i32
    return %arg0, %c0_i32 : i32, i32
  }
  func.func @transform_1(%arg0: i32) -> (i32, i32) {
    %c0_i32 = arith.constant 0 : i32
    %c0_i32_0 = arith.constant 0 : i32
    %c0_i32_1 = arith.constant 0 : i32
    return %c0_i32, %c0_i32_0 : i32, i32
  }
  func.func @transform_2(%arg0: i32) -> (i32, i32) {
    %c0_i32 = arith.constant 0 : i32
    %c0_i32_0 = arith.constant 0 : i32
    %c0_i32_1 = arith.constant 0 : i32
    return %c0_i32, %c0_i32_0 : i32, i32
  }
  func.func @transform_3(%arg0: i32) -> (i32, i32) {
    %c0_i32 = arith.constant 0 : i32
    %c0_i32_0 = arith.constant 0 : i32
    %c0_i32_1 = arith.constant 0 : i32
    return %c0_i32, %c0_i32_0 : i32, i32
  }
  func.func @transform_4(%arg0: i32) -> (i32, i32) {
    %c0_i32 = arith.constant 0 : i32
    %c0_i32_0 = arith.constant 0 : i32
    %c0_i32_1 = arith.constant 0 : i32
    return %c0_i32, %c0_i32_0 : i32, i32
  }
  func.func @transform_5(%arg0: i32) -> (i32, i32) {
    %c0_i32 = arith.constant 0 : i32
    %c0_i32_0 = arith.constant 0 : i32
    return %arg0, %c0_i32 : i32, i32
  }
}

</mosaic_0001>

<bundles_post_ra>
// kernel: tpu_custom_call.1
= control target key start
LH: loop header
LB: loop body
LE: loop exit
PB: predicated region body
PF: predicated region fallthrough
CT: control target
= control target key end

     0   :  { %10 = vsyncpa [#allocation3], 0  ;;  %s2163_s0 = inlined_call_operand.hbm [shape: bf16[304,256], index: 0, kind: input, shape index: {}]   ;;  %s2164_s1 = inlined_call_operand.hbm [shape: bf16[256,256], index: 1, kind: input, shape index: {}]   ;;  %s2165_s2 = inlined_call_operand.vmem [shape: f32[1,256], index: 2, kind: input, shape index: {}]   ;;  %s2166_s3 = inlined_call_operand.hbm [shape: bf16[256,128], index: 3, kind: input, shape index: {}]   ;;  %s2167_s4 = inlined_call_operand.vmem [shape: f32[1,128], index: 4, kind: input, shape index: {}]   ;;  %s2168_s5 = inlined_call_operand.hbm [shape: bf16[304,128], index: 5, kind: output, shape index: {}]  }
   0x1   :  { %12 = vsyncpa [#allocation3 + $0x1], 0 }
   0x2   :  { %13 = vsyncpa [#allocation6], 0 }
   0x3   :  { %14 = vsyncpa [#allocation4], 0 }
   0x4   :  { %16 = vsyncpa [#allocation4 + $0x1], 0  ;;  %s1865_s18 = smov 0   ;;  %s1867_s19 = smov 0  }
   0x5   :  { %s1869_s20 = smov 0   ;;  %s1871_s21 = smov 0  }
   0x6 LB: > { %s1886_s22 = sadd.s32 4294967295, %s1823_s21   ;;  %s1253_s23 = sadd.s32 4294967294, %s1823_s21   ;;  %s1823_s21 = sphi %s1871_s21, %s2191_s21   ;;  %s1819_s20 = sphi %s1869_s20, %s2190_s20   ;;  %s1815_s19 = sphi %s1867_s19, %s2189_s19   ;;  %s1811_s18 = sphi %s1865_s18, %s2188_s18  }
   0x7   : > { %p42_p0 = scmp.ne.s32.totalorder %s1815_s19, %s1811_s18  ;;  %p2170_p1 = scmp.eq.s32.totalorder %s1886_s22, 0 }
   0x8   : > { %p150_p2 = scmp.eq.s32.totalorder %s1886_s22, 1  ;;  %p156_p3 = scmp.eq.s32.totalorder %s1253_s23, 1 }
   0x9   : > { %p1895_p4 = por %p2170_p1, %p42_p0  ;;  %p1254_p5 = scmp.ge.s32.totalorder %s1823_s21, 1 }
   0xa   : > { %p1900_p6 = por %p156_p3, %p42_p0  ;;  %p163_p7 = scmp.lt.s32.totalorder %s1823_s21, 3 }
   0xb   : > { %s2174_s24 = scalar_select %p1895_p4, 1, 0 }
   0xc   : > { %s2175_s25 = scalar_select %p1900_p6, 1, 0 }
   0xd   : > { %p1905_p8 = pnand %p1254_p5, %p163_p7  ;;  %s1825_s27 = smov [#allocation5]  }
   0xe   : > { %s175_s28 = sshll.u32 %s1825_s27, 4  ;;  %s1826_s30 = smov [#allocation7]   ;;  %s176_s28 = int_to_ptr.vmem [resolvable:$true] %s175_s28 }
   0xf   : > { %s2176_s26 = scalar_select %p1905_p8, 1, 0 }
  0x10   : > { %p1521_p9 = pneg %p1905_p8  ;;  %s191_s6 = sshll.u32 %s1826_s30, 4  ;;  %s192_s6 = int_to_ptr.vmem [resolvable:$true] %s191_s6 }
  0x11   : > { %s1686_s7 = scalar_lea.vmem %s176_s28, 4096  ;;  %p1694_p5 = scmp.lt.s32.totalorder %s176_s28, %s176_s28 }
  0x12   : > { %p1914_p11 = pnand %p1521_p9, %p2170_p1  ;;  %p1687_p13 = scmp.ne.s32.totalorder %s176_s28, %s1686_s7 }
  0x13   : > { %p1695_p7 = scmp.lt.s32.totalorder %s1686_s7, %s1686_s7 }
  0x14   : > { %p1677_p12 = pneg %p1914_p11 }
  0x15   : > { %p1696_p10 = por %p1695_p7, %p1694_p5 }
  0x16   : > { %p1689_p0 = pnand %p1687_p13, %p1677_p12 }
  0x18   : > { %p1690_p3 = pneg %p1689_p0 }
  0x1a   : > { %p1697_p9 = pnand %p1696_p10, %p1690_p3 }
  0x1c   : > { %1700 = shalt.err (!%p1697_p9)
}
  0x1d   : > { %s2169_s8 = smov 128   ;;  %s1828_s9 = smov 8  }
  0x1e   : > { %1524 = dma.hbm_to_vmem [thread:$0]  (!%p1914_p11), %s2164_s1, 4096, %s176_s28, [#allocation6], %s2169_s8, %s2169_s8, %s1828_s9  }
  0x1f   : > { %s1712_s12 = scalar_lea.vmem %s192_s6, 2048  ;;  %p1720_p10 = scmp.lt.s32.totalorder %s192_s6, %s192_s6 }
  0x20   : > { %p1713_p13 = scmp.ne.s32.totalorder %s192_s6, %s1712_s12  ;;  %p1721_p3 = scmp.lt.s32.totalorder %s1712_s12, %s1712_s12 }
  0x22   : > { %p1715_p0 = pnand %p1713_p13, %p1677_p12  ;;  %p1722_p7 = por %p1721_p3, %p1720_p10 }
  0x24   : > { %p1716_p5 = pneg %p1715_p0 }
  0x26   : > { %p1723_p9 = pnand %p1722_p7, %p1716_p5 }
  0x28   : > { %1726 = shalt.err (!%p1723_p9)
}
  0x29   : > { %s1829_s13 = smov 64   ;;  %s1830_s14 = smov 4  }
  0x2a   : > { %1527 = dma.hbm_to_vmem [thread:$0]  (!%p1914_p11), %s2166_s3, 2048, %s192_s6, [#allocation6], %s1829_s13, %s1829_s13, %s1830_s14  }
  0x2b   : > { %s1940_s17 = sadd.s32 1, %s1823_s21   ;;  %s29_s27 = sadd.s32 1, %s1819_s20 }
  0x2c   : > { %s26_s23 = ssub.s32 %s1823_s21, %s1940_s17  ;;  %p36_p13 = scmp.ne.s32.totalorder %s1819_s20, %s1815_s19 }
  0x2d   : > { %p27_p12 = scmp.eq.s32.totalorder %s26_s23, 0  ;;  %p37_p0 = scmp.eq.s32.totalorder %s1823_s21, 0 }
  0x2e   : > { %p1953_p10 = por %p150_p2, %p36_p13  ;;  %p1538_p3 = scmp.lt.s32.totalorder %s1823_s21, 2 }
  0x2f   : > { %s1949_s28 = scalar_select %p27_p12, %s1819_s20, %s29_s27  }
  0x30   : > { %p38_p5 = por %p37_p0, %p36_p13  ;;  %s208_s29 = sand.u32 1, %s1819_s20  }
  0x31   : > { %s2178_s30 = scalar_select %p1953_p10, 1, 0 }
  0x32   : > { %s1506_s7 = smul.u32 152, %s208_s29  ;;  %p1960_p11 = pnand %p1538_p3, %p38_p5 }
  0x33   : > { %s1421_s6 = smul.u32 2432, %s1823_s21  ;;  %s1971_s16 = scalar_lea.sflag [#allocation3], %s208_s29 }
  0x34   : > { %s212_s14 = scalar_lea.vmem [#allocation2], %s1506_s7  ;;  %p1729_p7 = pneg %p1960_p11 }
  0x35   : > { %s1967_s13 = scalar_lea.hbm %s2163_s0, %s1421_s6  ;;  %s220_s15 = sshll.u32 %s212_s14, 4  ;;  %s1969_s15 = int_to_ptr.vmem [resolvable:$true] %s220_s15 }
  0x36   : > { %s1727_s23 = scalar_lea.hbm %s1967_s13, 2432  ;;  %s1732_s6 = scalar_lea.hbm %s2163_s0, 4864 }
  0x37   : > { %p1728_p2 = scmp.ne.s32.totalorder %s1967_s13, %s1727_s23  ;;  %p1733_p13 = scmp.lt.s32.totalorder %s1967_s13, %s2163_s0 }
  0x38   : > { %p1734_p0 = scmp.lt.s32.totalorder %s1732_s6, %s1727_s23 }
  0x39   : > { %p1730_p9 = pnand %p1729_p7, %p1728_p2 }
  0x3a   : > { %p1735_p5 = por %p1734_p0, %p1733_p13 }
  0x3b   : > { %p1731_p12 = pneg %p1730_p9 }
  0x3d   : > { %p1736_p3 = pnand %p1735_p5, %p1731_p12 }
  0x3f   : > { %1739 = shalt.err (!%p1736_p3)
}
  0x40   : > { %s1740_s29 = scalar_lea.vmem %s1969_s15, 2432  ;;  %s1831_s7 = smov [#allocation2]  }
  0x41   : > { %p1741_p1 = scmp.ne.s32.totalorder %s1969_s15, %s1740_s29  ;;  %s1745_s14 = sshll.u32 %s1831_s7, 4  ;;  %s1746_s14 = int_to_ptr.vmem [resolvable:$false] %s1745_s14 }
  0x42   : > { %s1747_s27 = scalar_lea.vmem %s1746_s14, 4864  ;;  %p1748_p9 = scmp.lt.s32.totalorder %s1969_s15, %s1746_s14 }
  0x43   : > { %p1743_p6 = pnand %p1741_p1, %p1729_p7  ;;  %p1749_p10 = scmp.lt.s32.totalorder %s1747_s27, %s1740_s29 }
  0x45   : > { %p1744_p2 = pneg %p1743_p6  ;;  %p1750_p4 = por %p1749_p10, %p1748_p9 }
  0x47   : > { %p1751_p8 = pnand %p1750_p4, %p1744_p2 }
  0x49   : > { %1754 = shalt.err (!%p1751_p8)
}
  0x4a   : > { %s2180_s8 = smov 128   ;;  %p2181_p1 = scmp.ne.s32.totalorder %s2176_s26, 0 }
  0x4b   : > { %1531 = dma.hbm_to_vmem [thread:$0]  (!%p1960_p11), %s1967_s13, 2432, %s1969_s15, %s1971_s16, %s2180_s8, %s2180_s8, %s1828_s9  }
  0x4c   : > { %232 = sbr.rel (%p2181_p1) target bundleno = 645 (0x285), region = 40  ;;  %s1998_s23 = sand.u32 (!%p2181_p1), 1, %s1815_s19  }
  0x4d   : > { %s1507_s11 = smul.u32 (!%p2181_p1), 152, %s1998_s23  ;;  %s235_s6 = scalar_lea.sflag (!%p2181_p1), [#allocation3], %s1998_s23 }
  0x4e   : > { %p2182_p4 = scmp.ne.s32.totalorder (!%p2181_p1), %s2174_s24, 0 }
  0x4f   : > { %s2002_s12 = scalar_lea.vmem (!%p2181_p1), [#allocation2], %s1507_s11 }
  0x51   : > { %1798 = dma.done.wait (%p2182_p4), %s235_s6, 2432  }
  0x52   : > { %1800 = vsyncadd (%p2182_p4), %s235_s6, 4294964864  ;;  %p2183_p6 = scmp.eq.s32.totalorder %s1886_s22, 0 }
  0x54   : > { %1802 = dma.done.wait (%p2183_p6), [#allocation6], 6144   ;;  %p2184_p8 = pmov %p2183_p6 }
  0x55   : > { %v1582_v0 = vld [vmem:[#allocation5 + $0x74] ss:$8 sps:$4 sm:$0xff]   ;;  %v1584_v1 = vld [vmem:[#allocation5 + $0x70] ss:$8 sps:$4 sm:$0xff]   ;;  %v1585_v2 = vld [vmem:[#allocation5 + $0x64] ss:$8 sps:$4 sm:$0xff]  }
  0x56   : > { %1804 = vsyncadd (%p2184_p8), [#allocation6], 4294961152  ;;  %597 = vmatprep.subr.bf16.mxu0 %v1582_v0  ;;  %v1587_v3 = vld [vmem:[#allocation5 + $0x60] ss:$8 sps:$4 sm:$0xff]   ;;  %v1588_v4 = vld [vmem:[#allocation5 + $0x54] ss:$8 sps:$4 sm:$0xff]  }
  0x57   : > { %598 = vmatpush1.bf16.msra.mxu0 %v1584_v1  ;;  %v1590_v5 = vld [vmem:[#allocation5 + $0x50] ss:$8 sps:$4 sm:$0xff]   ;;  %v1591_v6 = vld [vmem:[#allocation5 + $0x44] ss:$8 sps:$4 sm:$0xff]   ;;  %v1593_v7 = vld [vmem:[#allocation5 + $0x40] ss:$8 sps:$4 sm:$0xff]  }
  0x58   : > { %599 = vmatprep.subr.bf16.mxu0 %v1585_v2  ;;  %v1594_v8 = vld [vmem:[#allocation5 + $0x34] ss:$8 sps:$4 sm:$0xff]   ;;  %v1596_v9 = vld [vmem:[#allocation5 + $0x30] ss:$8 sps:$4 sm:$0xff]   ;;  %v1597_v10 = vld [vmem:[#allocation5 + $0x24] ss:$8 sps:$4 sm:$0xff]  }
  0x59   : > { %v1599_v11 = vld [vmem:[#allocation5 + $0x20] ss:$8 sps:$4 sm:$0xff]   ;;  %v1600_v12 = vld [vmem:[#allocation5 + $0x14] ss:$8 sps:$4 sm:$0xff]   ;;  %v1602_v14 = vld [vmem:[#allocation5 + $0x10] ss:$8 sps:$4 sm:$0xff]  }
  0x5a   : > { %v1632_v13 = vld [vmem:[%s2002_s12 + $0x4] ss:$8 sps:$4 sm:$0xff]   ;;  %v1605_v16 = vld [vmem:[#allocation5] ss:$8 sps:$4 sm:$0xff]   ;;  %v1608_v18 = vld [vmem:[#allocation5 + $0xf0] ss:$8 sps:$4 sm:$0xff]  }
  0x5b   : > { %600 = vmatpush1.bf16.msra.mxu0 %v1587_v3  ;;  %v1603_v15 = vld [vmem:[#allocation5 + $0x4] ss:$8 sps:$4 sm:$0xff]   ;;  %629 = vmatprep.mubr.bf16.mxu0 %v1632_v13  ;;  %v1606_v17 = vld [vmem:[#allocation5 + $0xf4] ss:$8 sps:$4 sm:$0xff]   ;;  %v1611_v20 = vld [vmem:[#allocation5 + $0xe0] ss:$8 sps:$4 sm:$0xff]  }
  0x5c   : > { %601 = vmatprep.subr.bf16.mxu0 %v1588_v4  ;;  %v1609_v19 = vld [vmem:[#allocation5 + $0xe4] ss:$8 sps:$4 sm:$0xff]   ;;  %v1612_v21 = vld [vmem:[#allocation5 + $0xd4] ss:$8 sps:$4 sm:$0xff]   ;;  %v1614_v27 = vld [vmem:[#allocation5 + $0xd0] ss:$8 sps:$4 sm:$0xff]  }
  0x5d   : > { %v1659_v22 = vld [vmem:[#allocation7 + $0x78] sm:$0xff]   ;;  %v1661_v24 = vld [vmem:[#allocation7 + $0x70] sm:$0xff]   ;;  %v1663_v26 = vld [vmem:[#allocation7 + $0x68] sm:$0xff]   ;;  %s1508_s13 = smul.u32 76, %s1998_s23  ;;  %p2185_p11 = scmp.ne.s32.totalorder %s2178_s30, 0 }
  0x5e   : > { %v1660_v23 = vld [vmem:[#allocation7 + $0x38] sm:$0xff]   ;;  %1430 = vmatprep.subr.bf16.mxu1 %v1659_v22  ;;  %v1662_v25 = vld [vmem:[#allocation7 + $0x30] sm:$0xff]   ;;  %v1615_v28 = vld [vmem:[#allocation5 + $0xc4] ss:$8 sps:$4 sm:$0xff]   ;;  %s1375_s16 = smul.u32 1216, %s1886_s22  ;;  %s1148_s22 = scalar_lea.sflag [#allocation4], %s1998_s23 }
  0x5f   : > { %602 = vmatpush1.bf16.msra.mxu0 %v1590_v5  ;;  %1431 = vmatpush3.bf16.msra.mxu1 %v1660_v23  ;;  %v1617_v29 = vld [vmem:[#allocation5 + $0xc0] ss:$8 sps:$4 sm:$0xff]   ;;  %v1618_v32 = vld [vmem:[#allocation5 + $0xb4] ss:$8 sps:$4 sm:$0xff]   ;;  %v1620_v35 = vld [vmem:[#allocation5 + $0xb0] ss:$8 sps:$4 sm:$0xff]   ;;  %v330_v5 = vlaneseq }
  0x60   : > { %603 = vmatprep.subr.bf16.mxu0 %v1591_v6  ;;  %1432 = vmatprep.subr.bf16.mxu1 %v1661_v24  ;;  %v1664_v30 = vld [vmem:[#allocation7 + $0x28] sm:$0xff]   ;;  %v1665_v31 = vld [vmem:[#allocation7 + $0x60] sm:$0xff]   ;;  %v1667_v34 = vld [vmem:[#allocation7 + $0x58] sm:$0xff]   ;;  %s2084_s15 = scalar_lea.vmem [#allocation8], %s1508_s13  ;;  %s2117_s27 = scalar_lea.hbm %s2168_s5, %s1375_s16 }
  0x61   : > { %v1666_v33 = vld [vmem:[#allocation7 + $0x20] sm:$0xff]   ;;  %v1668_v37 = vld [vmem:[#allocation7 + $0x18] sm:$0xff]   ;;  %v1669_v62 = vld [vmem:[#allocation7 + $0x50] sm:$0xff]   ;;  %v331_v6 = vshrl.u32 %v330_v5, 7  ;;  %s1161_s29 = sshll.u32 %s2084_s15, 4  ;;  %s1832_s11 = smov [#allocation8]   ;;  %s2119_s29 = int_to_ptr.vmem [resolvable:$true] %s1161_s29 }
  0x62   : > { %v1621_v36 = vld [vmem:[#allocation5 + $0xa4] ss:$8 sps:$4 sm:$0xff]   ;;  %v1623_v38 = vld [vmem:[#allocation5 + $0xa0] ss:$8 sps:$4 sm:$0xff]   ;;  %v1624_v39 = vld [vmem:[#allocation5 + $0x94] ss:$8 sps:$4 sm:$0xff]  }
  0x63   : > { %604 = vmatpush1.bf16.msra.mxu0 %v1593_v7  ;;  %1433 = vmatpush3.bf16.msra.mxu1 %v1662_v25  ;;  %v1626_v40 = vld [vmem:[#allocation5 + $0x90] ss:$8 sps:$4 sm:$0xff]   ;;  %v1627_v41 = vld [vmem:[#allocation5 + $0x84] ss:$8 sps:$4 sm:$0xff]   ;;  %v1629_v42 = vld [vmem:[#allocation5 + $0x80] ss:$8 sps:$4 sm:$0xff]  }
  0x64   : > { %605 = vmatprep.subr.bf16.mxu0 %v1594_v8  ;;  %1434 = vmatprep.subr.bf16.mxu1 %v1663_v26  ;;  %v1630_v43 = vld [vmem:[%s2002_s12] ss:$8 sps:$4 sm:$0xff]   ;;  %v1633_v44 = vld [vmem:[%s2002_s12 + $0x14] ss:$8 sps:$4 sm:$0xff]   ;;  %v1635_v45 = vld [vmem:[%s2002_s12 + $0x10] ss:$8 sps:$4 sm:$0xff]  }
  0x65   : > { %v1636_v46 = vld [vmem:[%s2002_s12 + $0x24] ss:$8 sps:$4 sm:$0xff]   ;;  %v1638_v47 = vld [vmem:[%s2002_s12 + $0x20] ss:$8 sps:$4 sm:$0xff]   ;;  %v1639_v48 = vld [vmem:[%s2002_s12 + $0x34] ss:$8 sps:$4 sm:$0xff]  }
  0x66   : > { %v1641_v49 = vld [vmem:[%s2002_s12 + $0x30] ss:$8 sps:$4 sm:$0xff]   ;;  %v1642_v50 = vld [vmem:[%s2002_s12 + $0x44] ss:$8 sps:$4 sm:$0xff]   ;;  %v1644_v51 = vld [vmem:[%s2002_s12 + $0x40] ss:$8 sps:$4 sm:$0xff]  }
  0x67   : > { %606 = vmatpush1.bf16.msra.mxu0 %v1596_v9  ;;  %1435 = vmatpush3.bf16.msra.mxu1 %v1664_v30  ;;  %v1645_v52 = vld [vmem:[%s2002_s12 + $0x54] ss:$8 sps:$4 sm:$0xff]   ;;  %v1647_v53 = vld [vmem:[%s2002_s12 + $0x50] ss:$8 sps:$4 sm:$0xff]   ;;  %v1648_v54 = vld [vmem:[%s2002_s12 + $0x64] ss:$8 sps:$4 sm:$0xff]  }
  0x68   : > { %607 = vmatprep.subr.bf16.mxu0 %v1597_v10  ;;  %1436 = vmatprep.subr.bf16.mxu1 %v1665_v31  ;;  %v1650_v55 = vld [vmem:[%s2002_s12 + $0x60] ss:$8 sps:$4 sm:$0xff]   ;;  %v1651_v56 = vld [vmem:[%s2002_s12 + $0x74] ss:$8 sps:$4 sm:$0xff]   ;;  %v1653_v57 = vld [vmem:[%s2002_s12 + $0x70] ss:$8 sps:$4 sm:$0xff]  }
  0x69   : > { %v1654_v58 = vld [vmem:[%s2002_s12 + $0x84] ss:$8 sps:$4 sm:$0xff]   ;;  %v294_v59 = vld [vmem:[%s2002_s12 + $0x90] sm:$0xff]  ;;  %v1656_v60 = vld [vmem:[%s2002_s12 + $0x80] ss:$8 sps:$4 sm:$0xff]   ;;  %v336_v7 = vsub.s32 1, %v331_v6 }
  0x6a   : > { %v1282_v61 = vcombine.high %v294_v59, %v294_v59  ;;  %v1670_v63 = vld [vmem:[#allocation7 + $0x10] sm:$0xff]   ;;  %v1281_v0 = vcombine.low %v294_v59, %v294_v59  ;;  %v1671_v1 = vld [vmem:[#allocation7 + $0x48] sm:$0xff]   ;;  %v1673_v3 = vld [vmem:[#allocation7 + $0x40] sm:$0xff]   ;;  %v332_v8 = vsub.s32 0, %v331_v6  ;;  %s1755_s8 = scalar_lea.vmem %s2119_s29, 1216  ;;  %s1759_s6 = sshll.u32 %s1832_s11, 4  ;;  %s1760_s6 = int_to_ptr.vmem [resolvable:$false] %s1759_s6 }
  0x6b   : > { %608 = vmatpush1.bf16.msra.mxu0 %v1599_v11  ;;  %1437 = vmatpush3.bf16.msra.mxu1 %v1666_v33  ;;  %v1672_v2 = vld [vmem:[#allocation7 + $0x8] sm:$0xff]   ;;  %v1674_v4 = vld [vmem:[#allocation7] sm:$0xff]   ;;  %v295_v9 = vld [vmem:[%s2165_s2] sm:$0x3]  ;;  %p1756_p10 = scmp.ne.s32.totalorder %s2119_s29, %s1755_s8  ;;  %s1761_s12 = scalar_lea.vmem %s1760_s6, 2432 }
  0x6c   : > { %609 = vmatprep.subr.bf16.mxu0 %v1600_v12  ;;  %1438 = vmatprep.subr.bf16.mxu1 %v1667_v34  ;;  %v2034_v11 = vrot.slane %v295_v9, %v336_v7  ;;  %v2036_v12 = vrot.slane %v295_v9, %v332_v8  ;;  %p1762_p13 = scmp.lt.s32.totalorder %s2119_s29, %s1760_s6  ;;  %p1763_p0 = scmp.lt.s32.totalorder %s1761_s12, %s1755_s8 }
  0x6d   : > { %p1757_p7 = pnand %p1756_p10, %p2185_p11 }
  0x6e   : > { %p1764_p5 = por %p1763_p0, %p1762_p13 }
  0x6f   : > { %610 = vmatpush1.bf16.msra.mxu0 %v1602_v14  ;;  %1439 = vmatpush3.bf16.msra.mxu1 %v1668_v37  ;;  %p1758_p12 = pneg %p1757_p7 }
  0x70   : > { %611 = vmatprep.subr.bf16.mxu0 %v1603_v15  ;;  %1440 = vmatprep.subr.bf16.mxu1 %v1669_v62 }
  0x71   : > { %p1765_p3 = pnand %p1764_p5, %p1758_p12 }
  0x73   : > { %612 = vmatpush1.bf16.msra.mxu0 %v1605_v16  ;;  %1441 = vmatpush3.bf16.msra.mxu1 %v1670_v63 }
  0x74   : > { %613 = vmatprep.subr.bf16.mxu0 %v1606_v17  ;;  %1442 = vmatprep.subr.bf16.mxu1 %v1671_v1 }
  0x77   : > { %614 = vmatpush2.bf16.msra.mxu0 %v1608_v18  ;;  %1443 = vmatpush3.bf16.msra.mxu1 %v1672_v2 }
  0x78   : > { %615 = vmatprep.subr.bf16.mxu0 %v1609_v19  ;;  %1444 = vmatprep.subr.bf16.mxu1 %v1673_v3 }
  0x7b   : > { %616 = vmatpush2.bf16.msra.mxu0 %v1611_v20  ;;  %1445 = vmatpush3.bf16.msra.mxu1 %v1674_v4 }
  0x7c   : > { %617 = vmatprep.subr.bf16.mxu0 %v1612_v21 }
  0x7f   : > { %618 = vmatpush2.bf16.msra.mxu0 %v1614_v27 }
  0x80   : > { %619 = vmatprep.subr.bf16.mxu0 %v1615_v28 }
  0x83   : > { %620 = vmatpush2.bf16.msra.mxu0 %v1617_v29 }
  0x84   : > { %621 = vmatprep.subr.bf16.mxu0 %v1618_v32 }
  0x87   : > { %622 = vmatpush2.bf16.msra.mxu0 %v1620_v35 }
  0x88   : > { %623 = vmatprep.subr.bf16.mxu0 %v1621_v36 }
  0x8b   : > { %624 = vmatpush2.bf16.msra.mxu0 %v1623_v38 }
  0x8c   : > { %625 = vmatprep.subr.bf16.mxu0 %v1624_v39 }
  0x8f   : > { %626 = vmatpush2.bf16.msra.mxu0 %v1626_v40 }
  0x90   : > { %627 = vmatprep.subr.bf16.mxu0 %v1627_v41 }
  0x93   : > { %628 = vmatpush2.bf16.msra.mxu0 %v1629_v42 }
  0x96   : > { %630 = vmatmul.mubr.bf16.vlgmr.msra.gmra.mxu0 %v1630_v43 }
  0x97   : > { %639 = vmatprep.mubr.bf16.mxu0 %v1633_v44 }
  0x9e   : > { %640 = vmatmul.mubr.bf16.gmra.mxu0 %v1635_v45 }
  0x9f   : > { %649 = vmatprep.mubr.bf16.mxu0 %v1636_v46 }
  0xa6   : > { %650 = vmatmul.mubr.bf16.gmra.mxu0 %v1638_v47 }
  0xa7   : > { %659 = vmatprep.mubr.bf16.mxu0 %v1639_v48 }
  0xae   : > { %660 = vmatmul.mubr.bf16.gmra.mxu0 %v1641_v49 }
  0xaf   : > { %669 = vmatprep.mubr.bf16.mxu0 %v1642_v50 }
  0xb6   : > { %670 = vmatmul.mubr.bf16.gmra.mxu0 %v1644_v51 }
  0xb7   : > { %679 = vmatprep.mubr.bf16.mxu0 %v1645_v52 }
  0xbe   : > { %680 = vmatmul.mubr.bf16.gmra.mxu0 %v1647_v53 }
  0xbf   : > { %689 = vmatprep.mubr.bf16.mxu0 %v1648_v54 }
  0xc6   : > { %690 = vmatmul.mubr.bf16.gmra.mxu0 %v1650_v55 }
  0xc7   : > { %699 = vmatprep.mubr.bf16.mxu0 %v1651_v56 }
  0xce   : > { %700 = vmatmul.mubr.bf16.gmra.mxu0 %v1653_v57 }
  0xcf   : > { %709 = vmatprep.mubr.bf16.mxu0 %v1654_v58 }
  0xd6   : > { %710 = vmatmul.mubr.bf16.gmra.mxu0 %v1656_v60 }
  0xd7   : > { %719 = vmatprep.mubr.bf16.mxu0 %v1282_v61 }
  0xde   : > { %720 = vmatmul.mubr.bf16.gmra.mxu0 %v1281_v0 }
 0x156   : > { %v631_v10 = vpop.f32.mrf.mxu0 }
 0x157   : > { %v632_v17 = vadd.f32 %v631_v10, %v2036_v12 }
 0x158   : > { %v633_v13 = vpop.f32.mrf.mxu0 }
 0x159   : > { %v634_v15 = vadd.f32 %v633_v13, %v2034_v11  ;;  %v728_v24 = vmax.f32 %v632_v17, 0.0 }
 0x15a   : > { %v635_v14 = vpop.f32.mrf.mxu0 }
 0x15b   : > { %v636_v16 = vadd.f32 %v635_v14, %v2036_v12  ;;  %v729_v22 = vmax.f32 %v634_v15, 0.0 }
 0x15c   : > { %v637_v18 = vpop.f32.mrf.mxu0 }
 0x15d   : > { %v638_v19 = vadd.f32 %v637_v18, %v2034_v11  ;;  %v730_v20 = vmax.f32 %v636_v16, 0.0 }
 0x15e   : > { %v641_v21 = vpop.f32.mrf.mxu0 }
 0x15f   : > { %v731_v23 = vmax.f32 %v638_v19, 0.0  ;;  %v766_v27 = vpack.c.bf16 %v730_v20, %v728_v24  ;;  %v642_v31 = vadd.f32 %v641_v21, %v2036_v12 }
 0x160   : > { %v643_v25 = vpop.f32.mrf.mxu0 }
 0x161   : > { %v767_v26 = vpack.c.bf16 %v731_v23, %v729_v22  ;;  %v644_v29 = vadd.f32 %v643_v25, %v2034_v11  ;;  %v732_v38 = vmax.f32 %v642_v31, 0.0 }
 0x162   : > { %v645_v28 = vpop.f32.mrf.mxu0 }
 0x163   : > { %v646_v30 = vadd.f32 %v645_v28, %v2036_v12  ;;  %952 = vmatprep.mubr.bf16.mxu1 %v767_v26  ;;  %v733_v36 = vmax.f32 %v644_v29, 0.0 }
 0x164   : > { %v647_v32 = vpop.f32.mrf.mxu0  ;;  %953 = vmatmul.mubr.bf16.vlgmr.msra.gmra.mxu1 %v766_v27 }
 0x165   : > { %v648_v33 = vadd.f32 %v647_v32, %v2034_v11  ;;  %v734_v34 = vmax.f32 %v646_v30, 0.0 }
 0x166   : > { %v651_v35 = vpop.f32.mrf.mxu0 }
 0x167   : > { %v735_v37 = vmax.f32 %v648_v33, 0.0  ;;  %v768_v41 = vpack.c.bf16 %v734_v34, %v732_v38  ;;  %v652_v45 = vadd.f32 %v651_v35, %v2036_v12 }
 0x168   : > { %v653_v39 = vpop.f32.mrf.mxu0 }
 0x169   : > { %v769_v40 = vpack.c.bf16 %v735_v37, %v733_v36  ;;  %v654_v43 = vadd.f32 %v653_v39, %v2034_v11  ;;  %v736_v52 = vmax.f32 %v652_v45, 0.0 }
 0x16a   : > { %v655_v42 = vpop.f32.mrf.mxu0 }
 0x16b   : > { %v656_v44 = vadd.f32 %v655_v42, %v2036_v12  ;;  %960 = vmatprep.mubr.bf16.mxu1 %v769_v40  ;;  %v737_v50 = vmax.f32 %v654_v43, 0.0 }
 0x16c   : > { %v657_v46 = vpop.f32.mrf.mxu0  ;;  %961 = vmatmul.mubr.bf16.gmra.mxu1 %v768_v41 }
 0x16d   : > { %v658_v47 = vadd.f32 %v657_v46, %v2034_v11  ;;  %v738_v48 = vmax.f32 %v656_v44, 0.0 }
 0x16e   : > { %v661_v49 = vpop.f32.mrf.mxu0 }
 0x16f   : > { %v739_v51 = vmax.f32 %v658_v47, 0.0  ;;  %v770_v55 = vpack.c.bf16 %v738_v48, %v736_v52  ;;  %v662_v59 = vadd.f32 %v661_v49, %v2036_v12 }
 0x170   : > { %v663_v53 = vpop.f32.mrf.mxu0 }
 0x171   : > { %v771_v54 = vpack.c.bf16 %v739_v51, %v737_v50  ;;  %v664_v57 = vadd.f32 %v663_v53, %v2034_v11  ;;  %v740_v2 = vmax.f32 %v662_v59, 0.0 }
 0x172   : > { %v665_v56 = vpop.f32.mrf.mxu0 }
 0x173   : > { %v666_v58 = vadd.f32 %v665_v56, %v2036_v12  ;;  %968 = vmatprep.mubr.bf16.mxu1 %v771_v54  ;;  %v741_v0 = vmax.f32 %v664_v57, 0.0 }
 0x174   : > { %v667_v60 = vpop.f32.mrf.mxu0  ;;  %969 = vmatmul.mubr.bf16.gmra.mxu1 %v770_v55 }
 0x175   : > { %v668_v61 = vadd.f32 %v667_v60, %v2034_v11  ;;  %v742_v62 = vmax.f32 %v666_v58, 0.0 }
 0x176   : > { %v671_v63 = vpop.f32.mrf.mxu0 }
 0x177   : > { %v743_v1 = vmax.f32 %v668_v61, 0.0  ;;  %v772_v5 = vpack.c.bf16 %v742_v62, %v740_v2  ;;  %v672_v9 = vadd.f32 %v671_v63, %v2036_v12 }
 0x178   : > { %v673_v3 = vpop.f32.mrf.mxu0 }
 0x179   : > { %v773_v4 = vpack.c.bf16 %v743_v1, %v741_v0  ;;  %v674_v7 = vadd.f32 %v673_v3, %v2034_v11  ;;  %v744_v18 = vmax.f32 %v672_v9, 0.0 }
 0x17a   : > { %v675_v6 = vpop.f32.mrf.mxu0 }
 0x17b   : > { %v676_v8 = vadd.f32 %v675_v6, %v2036_v12  ;;  %976 = vmatprep.mubr.bf16.mxu1 %v773_v4  ;;  %v745_v16 = vmax.f32 %v674_v7, 0.0 }
 0x17c   : > { %v677_v10 = vpop.f32.mrf.mxu0  ;;  %977 = vmatmul.mubr.bf16.gmra.mxu1 %v772_v5 }
 0x17d   : > { %v678_v13 = vadd.f32 %v677_v10, %v2034_v11  ;;  %v746_v14 = vmax.f32 %v676_v8, 0.0 }
 0x17e   : > { %v681_v15 = vpop.f32.mrf.mxu0 }
 0x17f   : > { %v747_v17 = vmax.f32 %v678_v13, 0.0  ;;  %v774_v21 = vpack.c.bf16 %v746_v14, %v744_v18  ;;  %v682_v25 = vadd.f32 %v681_v15, %v2036_v12 }
 0x180   : > { %v683_v19 = vpop.f32.mrf.mxu0 }
 0x181   : > { %v775_v20 = vpack.c.bf16 %v747_v17, %v745_v16  ;;  %v684_v23 = vadd.f32 %v683_v19, %v2034_v11  ;;  %v748_v32 = vmax.f32 %v682_v25, 0.0 }
 0x182   : > { %v685_v22 = vpop.f32.mrf.mxu0 }
 0x183   : > { %v686_v24 = vadd.f32 %v685_v22, %v2036_v12  ;;  %984 = vmatprep.mubr.bf16.mxu1 %v775_v20  ;;  %v749_v30 = vmax.f32 %v684_v23, 0.0 }
 0x184   : > { %v687_v26 = vpop.f32.mrf.mxu0  ;;  %985 = vmatmul.mubr.bf16.gmra.mxu1 %v774_v21 }
 0x185   : > { %v688_v27 = vadd.f32 %v687_v26, %v2034_v11  ;;  %v750_v28 = vmax.f32 %v686_v24, 0.0 }
 0x186   : > { %v691_v29 = vpop.f32.mrf.mxu0 }
 0x187   : > { %v751_v31 = vmax.f32 %v688_v27, 0.0  ;;  %v776_v35 = vpack.c.bf16 %v750_v28, %v748_v32  ;;  %v692_v39 = vadd.f32 %v691_v29, %v2036_v12 }
 0x188   : > { %v693_v33 = vpop.f32.mrf.mxu0 }
 0x189   : > { %v777_v34 = vpack.c.bf16 %v751_v31, %v749_v30  ;;  %v694_v37 = vadd.f32 %v693_v33, %v2034_v11  ;;  %v752_v46 = vmax.f32 %v692_v39, 0.0 }
 0x18a   : > { %v695_v36 = vpop.f32.mrf.mxu0 }
 0x18b   : > { %v696_v38 = vadd.f32 %v695_v36, %v2036_v12  ;;  %992 = vmatprep.mubr.bf16.mxu1 %v777_v34  ;;  %v753_v44 = vmax.f32 %v694_v37, 0.0 }
 0x18c   : > { %v697_v40 = vpop.f32.mrf.mxu0  ;;  %993 = vmatmul.mubr.bf16.gmra.mxu1 %v776_v35 }
 0x18d   : > { %v698_v41 = vadd.f32 %v697_v40, %v2034_v11  ;;  %v754_v42 = vmax.f32 %v696_v38, 0.0 }
 0x18e   : > { %v701_v43 = vpop.f32.mrf.mxu0 }
 0x18f   : > { %v755_v45 = vmax.f32 %v698_v41, 0.0  ;;  %v778_v49 = vpack.c.bf16 %v754_v42, %v752_v46  ;;  %v702_v53 = vadd.f32 %v701_v43, %v2036_v12 }
 0x190   : > { %v703_v47 = vpop.f32.mrf.mxu0 }
 0x191   : > { %v779_v48 = vpack.c.bf16 %v755_v45, %v753_v44  ;;  %v704_v51 = vadd.f32 %v703_v47, %v2034_v11  ;;  %v756_v60 = vmax.f32 %v702_v53, 0.0 }
 0x192   : > { %v705_v50 = vpop.f32.mrf.mxu0 }
 0x193   : > { %v706_v52 = vadd.f32 %v705_v50, %v2036_v12  ;;  %1000 = vmatprep.mubr.bf16.mxu1 %v779_v48  ;;  %v757_v58 = vmax.f32 %v704_v51, 0.0 }
 0x194   : > { %v707_v54 = vpop.f32.mrf.mxu0  ;;  %1001 = vmatmul.mubr.bf16.gmra.mxu1 %v778_v49 }
 0x195   : > { %v708_v55 = vadd.f32 %v707_v54, %v2034_v11  ;;  %v758_v56 = vmax.f32 %v706_v52, 0.0 }
 0x196   : > { %v711_v57 = vpop.f32.mrf.mxu0 }
 0x197   : > { %v759_v59 = vmax.f32 %v708_v55, 0.0  ;;  %v780_v63 = vpack.c.bf16 %v758_v56, %v756_v60  ;;  %v712_v3 = vadd.f32 %v711_v57, %v2036_v12 }
 0x198   : > { %v713_v61 = vpop.f32.mrf.mxu0 }
 0x199   : > { %v781_v62 = vpack.c.bf16 %v759_v59, %v757_v58  ;;  %v714_v1 = vadd.f32 %v713_v61, %v2034_v11  ;;  %v760_v10 = vmax.f32 %v712_v3, 0.0 }
 0x19a   : > { %v715_v0 = vpop.f32.mrf.mxu0 }
 0x19b   : > { %v716_v2 = vadd.f32 %v715_v0, %v2036_v12  ;;  %1008 = vmatprep.mubr.bf16.mxu1 %v781_v62  ;;  %v761_v8 = vmax.f32 %v714_v1, 0.0 }
 0x19c   : > { %v717_v4 = vpop.f32.mrf.mxu0  ;;  %1009 = vmatmul.mubr.bf16.gmra.mxu1 %v780_v63 }
 0x19d   : > { %v718_v5 = vadd.f32 %v717_v4, %v2034_v11  ;;  %v762_v6 = vmax.f32 %v716_v2, 0.0 }
 0x19e   : > { %v721_v7 = vpop.f32.mrf.mxu0 }
 0x19f   : > { %v763_v9 = vmax.f32 %v718_v5, 0.0  ;;  %v782_v16 = vpack.c.bf16 %v762_v6, %v760_v10  ;;  %v722_v17 = vadd.f32 %v721_v7, %v2036_v12 }
 0x1a0   : > { %v723_v13 = vpop.f32.mrf.mxu0 }
 0x1a1   : > { %v783_v14 = vpack.c.bf16 %v763_v9, %v761_v8  ;;  %v724_v15 = vadd.f32 %v723_v13, %v2034_v11  ;;  %v764_v22 = vmax.f32 %v722_v17, 0.0  ;;  %v2079_v11 = vld [vmem:[%s2167_s4] ss:$0 sm:$0xff] }
 0x1a2   : > { %v725_v18 = vpop.f32.mrf.mxu0 }
 0x1a3   : > { %v765_v19 = vmax.f32 %v724_v15, 0.0  ;;  %1016 = vmatprep.mubr.bf16.mxu1 %v783_v14  ;;  %v784_v23 = vpack.c.bf16 %v764_v22, %v764_v22 }
 0x1a4   : > { %v726_v20 = vpop.f32.mrf.mxu0  ;;  %1017 = vmatmul.mubr.bf16.gmra.mxu1 %v782_v16 }
 0x1a5   : > { %v785_v21 = vpack.c.bf16 %v765_v19, %v765_v19 }
 0x1a7   : > { %1024 = vmatprep.mubr.bf16.mxu1 %v785_v21 }
 0x1ac   : > { %1025 = vmatmul.mubr.bf16.gmra.mxu1 %v784_v23 }
 0x224   : > { %v1446_v24 = vpop.f32.mrf.mxu1 }
 0x226   : > { %v1447_v25 = vpop.f32.mrf.mxu1 }
 0x227   : > { %v1448_v26 = vadd.f32 %v1447_v25, %v1446_v24 }
 0x228   : > { %v1449_v12 = vpop.f32.mrf.mxu1 }
 0x229   : > { %v955_v28 = vadd.f32 %v1448_v26, %v2079_v11 }
 0x22a   : > { %v1450_v27 = vpop.f32.mrf.mxu1 }
 0x22b   : > { %v1451_v29 = vadd.f32 %v1450_v27, %v1449_v12  ;;  %v1032_v33 = vmax.f32 %v955_v28, 0.0 }
 0x22c   : > { %v1452_v30 = vpop.f32.mrf.mxu1 }
 0x22d   : > { %v958_v31 = vadd.f32 %v1451_v29, %v2079_v11 }
 0x22e   : > { %v1453_v32 = vpop.f32.mrf.mxu1 }
 0x22f   : > { %v1033_v34 = vmax.f32 %v958_v31, 0.0  ;;  %v1454_v35 = vadd.f32 %v1453_v32, %v1452_v30 }
 0x230   : > { %v1455_v36 = vpop.f32.mrf.mxu1 }
 0x231   : > { %v1379_v37 = vpack.c.bf16 %v1033_v34, %v1032_v33  ;;  %v963_v39 = vadd.f32 %v1454_v35, %v2079_v11 }
 0x232   : > { %v1456_v38 = vpop.f32.mrf.mxu1 }
 0x233   : > { %1380 = vst [vmem:[%s2084_s15] sm:$0xff] %v1379_v37   ;;  %v1457_v40 = vadd.f32 %v1456_v38, %v1455_v36  ;;  %v1034_v44 = vmax.f32 %v963_v39, 0.0 }
 0x234   : > { %v1458_v41 = vpop.f32.mrf.mxu1 }
 0x235   : > { %v966_v42 = vadd.f32 %v1457_v40, %v2079_v11 }
 0x236   : > { %v1459_v43 = vpop.f32.mrf.mxu1 }
 0x237   : > { %v1035_v45 = vmax.f32 %v966_v42, 0.0  ;;  %v1460_v46 = vadd.f32 %v1459_v43, %v1458_v41 }
 0x238   : > { %v1461_v47 = vpop.f32.mrf.mxu1 }
 0x239   : > { %v1384_v48 = vpack.c.bf16 %v1035_v45, %v1034_v44  ;;  %v971_v50 = vadd.f32 %v1460_v46, %v2079_v11 }
 0x23a   : > { %v1462_v49 = vpop.f32.mrf.mxu1 }
 0x23b   : > { %1422 = vst [vmem:[%s2084_s15 + $0x8] sm:$0xff] %v1384_v48   ;;  %v1463_v51 = vadd.f32 %v1462_v49, %v1461_v47  ;;  %v1036_v55 = vmax.f32 %v971_v50, 0.0 }
 0x23c   : > { %v1464_v52 = vpop.f32.mrf.mxu1 }
 0x23d   : > { %v974_v53 = vadd.f32 %v1463_v51, %v2079_v11 }
 0x23e   : > { %v1465_v54 = vpop.f32.mrf.mxu1 }
 0x23f   : > { %v1037_v56 = vmax.f32 %v974_v53, 0.0  ;;  %v1466_v57 = vadd.f32 %v1465_v54, %v1464_v52 }
 0x240   : > { %v1467_v58 = vpop.f32.mrf.mxu1 }
 0x241   : > { %v1389_v59 = vpack.c.bf16 %v1037_v56, %v1036_v55  ;;  %v979_v61 = vadd.f32 %v1466_v57, %v2079_v11 }
 0x242   : > { %v1468_v60 = vpop.f32.mrf.mxu1 }
 0x243   : > { %1423 = vst [vmem:[%s2084_s15 + $0x10] sm:$0xff] %v1389_v59   ;;  %v1469_v62 = vadd.f32 %v1468_v60, %v1467_v58  ;;  %v1038_v2 = vmax.f32 %v979_v61, 0.0 }
 0x244   : > { %v1470_v63 = vpop.f32.mrf.mxu1 }
 0x245   : > { %v982_v0 = vadd.f32 %v1469_v62, %v2079_v11 }
 0x246   : > { %v1471_v1 = vpop.f32.mrf.mxu1 }
 0x247   : > { %v1039_v3 = vmax.f32 %v982_v0, 0.0  ;;  %v1472_v4 = vadd.f32 %v1471_v1, %v1470_v63 }
 0x248   : > { %v1473_v5 = vpop.f32.mrf.mxu1 }
 0x249   : > { %v1394_v6 = vpack.c.bf16 %v1039_v3, %v1038_v2  ;;  %v987_v8 = vadd.f32 %v1472_v4, %v2079_v11 }
 0x24a   : > { %v1474_v7 = vpop.f32.mrf.mxu1 }
 0x24b   : > { %1424 = vst [vmem:[%s2084_s15 + $0x18] sm:$0xff] %v1394_v6   ;;  %v1475_v9 = vadd.f32 %v1474_v7, %v1473_v5  ;;  %v1040_v15 = vmax.f32 %v987_v8, 0.0 }
 0x24c   : > { %v1476_v10 = vpop.f32.mrf.mxu1 }
 0x24d   : > { %v990_v13 = vadd.f32 %v1475_v9, %v2079_v11 }
 0x24e   : > { %v1477_v14 = vpop.f32.mrf.mxu1 }
 0x24f   : > { %v1041_v16 = vmax.f32 %v990_v13, 0.0  ;;  %v1478_v17 = vadd.f32 %v1477_v14, %v1476_v10 }
 0x250   : > { %v1479_v18 = vpop.f32.mrf.mxu1 }
 0x251   : > { %v1399_v19 = vpack.c.bf16 %v1041_v16, %v1040_v15  ;;  %v995_v21 = vadd.f32 %v1478_v17, %v2079_v11 }
 0x252   : > { %v1480_v20 = vpop.f32.mrf.mxu1 }
 0x253   : > { %1425 = vst [vmem:[%s2084_s15 + $0x20] sm:$0xff] %v1399_v19   ;;  %v1481_v22 = vadd.f32 %v1480_v20, %v1479_v18  ;;  %v1042_v26 = vmax.f32 %v995_v21, 0.0 }
 0x254   : > { %v1482_v23 = vpop.f32.mrf.mxu1 }
 0x255   : > { %v998_v24 = vadd.f32 %v1481_v22, %v2079_v11 }
 0x256   : > { %v1483_v25 = vpop.f32.mrf.mxu1 }
 0x257   : > { %v1043_v12 = vmax.f32 %v998_v24, 0.0  ;;  %v1484_v27 = vadd.f32 %v1483_v25, %v1482_v23 }
 0x258   : > { %v1485_v28 = vpop.f32.mrf.mxu1 }
 0x259   : > { %v1404_v29 = vpack.c.bf16 %v1043_v12, %v1042_v26  ;;  %v1003_v31 = vadd.f32 %v1484_v27, %v2079_v11 }
 0x25a   : > { %v1486_v30 = vpop.f32.mrf.mxu1 }
 0x25b   : > { %1426 = vst [vmem:[%s2084_s15 + $0x28] sm:$0xff] %v1404_v29   ;;  %v1487_v32 = vadd.f32 %v1486_v30, %v1485_v28  ;;  %v1044_v36 = vmax.f32 %v1003_v31, 0.0 }
 0x25c   : > { %v1488_v33 = vpop.f32.mrf.mxu1 }
 0x25d   : > { %v1006_v34 = vadd.f32 %v1487_v32, %v2079_v11 }
 0x25e   : > { %v1489_v35 = vpop.f32.mrf.mxu1 }
 0x25f   : > { %v1045_v37 = vmax.f32 %v1006_v34, 0.0  ;;  %v1490_v38 = vadd.f32 %v1489_v35, %v1488_v33 }
 0x260   : > { %v1491_v39 = vpop.f32.mrf.mxu1 }
 0x261   : > { %v1409_v40 = vpack.c.bf16 %v1045_v37, %v1044_v36  ;;  %v1011_v42 = vadd.f32 %v1490_v38, %v2079_v11 }
 0x262   : > { %v1492_v41 = vpop.f32.mrf.mxu1 }
 0x263   : > { %1427 = vst [vmem:[%s2084_s15 + $0x30] sm:$0xff] %v1409_v40   ;;  %v1493_v43 = vadd.f32 %v1492_v41, %v1491_v39  ;;  %v1046_v47 = vmax.f32 %v1011_v42, 0.0 }
 0x264   : > { %v1494_v44 = vpop.f32.mrf.mxu1 }
 0x265   : > { %v1014_v45 = vadd.f32 %v1493_v43, %v2079_v11 }
 0x266   : > { %v1495_v46 = vpop.f32.mrf.mxu1 }
 0x267   : > { %v1047_v48 = vmax.f32 %v1014_v45, 0.0  ;;  %v1496_v49 = vadd.f32 %v1495_v46, %v1494_v44 }
 0x268   : > { %v1497_v50 = vpop.f32.mrf.mxu1 }
 0x269   : > { %v1414_v51 = vpack.c.bf16 %v1047_v48, %v1046_v47  ;;  %v1019_v53 = vadd.f32 %v1496_v49, %v2079_v11 }
 0x26a   : > { %v1498_v52 = vpop.f32.mrf.mxu1 }
 0x26b   : > { %1428 = vst [vmem:[%s2084_s15 + $0x38] sm:$0xff] %v1414_v51   ;;  %v1499_v54 = vadd.f32 %v1498_v52, %v1497_v50  ;;  %v1048_v58 = vmax.f32 %v1019_v53, 0.0 }
 0x26c   : > { %v1500_v55 = vpop.f32.mrf.mxu1 }
 0x26d   : > { %v1022_v56 = vadd.f32 %v1499_v54, %v2079_v11 }
 0x26e   : > { %v1501_v57 = vpop.f32.mrf.mxu1 }
 0x26f   : > { %v1049_v59 = vmax.f32 %v1022_v56, 0.0  ;;  %v1502_v60 = vadd.f32 %v1501_v57, %v1500_v55 }
 0x270   : > { %v1503_v61 = vpop.f32.mrf.mxu1 }
 0x271   : > { %v1419_v62 = vpack.c.bf16 %v1049_v59, %v1048_v58  ;;  %v1027_v63 = vadd.f32 %v1502_v60, %v2079_v11 }
 0x272   : > { %v1504_v0 = vpop.f32.mrf.mxu1 }
 0x273   : > { %1429 = vst [vmem:[%s2084_s15 + $0x40] sm:$0xff] %v1419_v62   ;;  %v1050_v1 = vmax.f32 %v1027_v63, 0.0 }
 0x275   : > { %v1374_v2 = vpack.c.bf16 %v1050_v1, %v1050_v1 }
 0x277   : > { %1146 = vst [vmem:[%s2084_s15 + $0x48] sm:$0xf] %v1374_v2 }
 0x278   : > { %1768 = shalt.err (!%p1765_p3)
}
 0x279   : > { %s1769_s24 = scalar_lea.hbm %s2117_s27, 1216  ;;  %s1773_s10 = scalar_lea.hbm %s2168_s5, 2432 }
 0x27a   : > { %p1770_p2 = scmp.ne.s32.totalorder %s2117_s27, %s1769_s24  ;;  %p1774_p4 = scmp.lt.s32.totalorder %s2117_s27, %s2168_s5 }
 0x27b   : > { %p1775_p6 = scmp.lt.s32.totalorder %s1773_s10, %s1769_s24 }
 0x27c   : > { %p1771_p9 = pnand %p1770_p2, %p2185_p11 }
 0x27d   : > { %p1776_p8 = por %p1775_p6, %p1774_p4 }
 0x27e   : > { %p1772_p1 = pneg %p1771_p9 }
 0x280   : > { %p1777_p10 = pnand %p1776_p8, %p1772_p1 }
 0x282   : > { %1780 = shalt.err (!%p1777_p10)
}
 0x283   : > { %s1833_s16 = smov 64   ;;  %s1834_s7 = smov 4  }
 0x284   : > { %1519 = dma.vmem_to_hbm [thread:$0]  (%p2185_p11), %s2119_s29, 1216, %s2117_s27, %s1148_s22, %s1833_s16, %s1833_s16, %s1834_s7  }
 0x285 PF: > { %s1176_s14 = sand.u32 1, %s1811_s18   ;;  %p2186_p7 = scmp.ne.s32.totalorder %s2175_s25, 0 }
 0x286   : > { %p2187_p12 = scmp.ge.s32.totalorder %s1823_s21, 2  ;;  %s1177_s8 = scalar_lea.sflag [#allocation4], %s1176_s14 }
 0x288   : > { %p1533_p13 = pnand %p2187_p12, %p2186_p7 }
 0x28a   : > { %p1534_p0 = pneg %p1533_p13 }
 0x28c   : > { %1806 = dma.done.wait (%p1534_p0), %s1177_s8, 1216  }
 0x28d   : > { %1808 = vsyncadd (%p1534_p0), %s1177_s8, 4294966080  ;;  %p19_p5 = scmp.ge.s32.totalorder %s1940_s17, 4   ;;  %s2188_s18 = smov %s1815_s19 }
 0x28e   : > { %s2189_s19 = smov %s1819_s20  ;;  %s2190_s20 = smov %s1949_s28 }
 0x28f   : > { %s2191_s21 = smov %s1940_s17  ;;  %21 = sbr.rel (!%p19_p5) target bundleno = 6 (0x6), region = 93 }
 0x294   :  { %1182 = vsyncpa [#allocation3], 1 }
 0x295   :  { %1184 = vsyncpa [#allocation3 + $0x1], 1 }
 0x296   :  { %1185 = vsyncpa [#allocation6], 1 }
 0x297   :  { %1186 = vsyncpa [#allocation4], 1 }
 0x298   :  { %1188 = vsyncpa [#allocation4 + $0x1], 1 }

</bundles_post_ra>
